<compile_context>
chip_gen: v7x
topology: tpu7x:2x2x1
jax: 0.10.0
libtpu: 0.0.40
codegen_flags: <defaults>
</compile_context>

<pallas_src>
import jax
import jax.numpy as jnp
from jax import lax
from jax.experimental import pallas as pl
from jax.experimental.pallas import tpu as pltpu


def _align_loss_kernel(bi_ref, bj_ref,            # scalar-prefetch (SMEM)
                       emb_i_ref, emb_j_ref,      # (T, D) compute-dtype tiles
                       lab_i_ref, lab_j_ref,      # (T, 1) / (1, T) int32 labels
                       sum_ref, cnt_ref):         # (1, 1, 1) f32 partials
    t = pl.program_id(0)
    is_diag = bi_ref[t] == bj_ref[t]

    emb_i = emb_i_ref[...]                        # (T, D)
    emb_j = emb_j_ref[...]                        # (T, D)

    # Gram tile on the MXU: emb_i @ emb_j.T with f32 accumulation.
    gram = lax.dot_general(
        emb_i, emb_j,
        dimension_numbers=(((1,), (1,)), ((), ())),
        preferred_element_type=jnp.float32)       # (T, T) f32

    # Same-cluster mask via a VPU broadcast-compare (no onehot matmul).
    same = (lab_i_ref[...] == lab_j_ref[...]).astype(jnp.float32)   # (T, T)

    tile_sum = jnp.sum(gram * same)
    tile_cnt = jnp.sum(same)

    # Off-diagonal tile pairs (j > i) are visited once -> double them.
    sum_ref[...] = jnp.reshape(2.0 * tile_sum, (1, 1, 1))
    cnt_ref[...] = jnp.reshape(2.0 * tile_cnt, (1, 1, 1))

    # Diagonal-tile path (cold for most steps): count once and remove the
    # self pairs analytically:
    #   trace = sum_r ||e_r||^2   (cheap VPU reduce over the row block)
    @pl.when(is_diag)
    def _():
        emb_f32 = emb_i.astype(jnp.float32)
        trace = jnp.sum(emb_f32 * emb_f32)
        n_rows = float(emb_i_ref.shape[0])
        sum_ref[...] = jnp.reshape(tile_sum - trace, (1, 1, 1))
        cnt_ref[...] = jnp.reshape(tile_cnt - n_rows, (1, 1, 1))


def align_loss(embedding, cluster_out, *, tile=512,
               compute_dtype=jnp.bfloat16):
    """embedding: (N, D), cluster_out: (N, C) -> scalar loss (f32)."""
    embedding = jnp.asarray(embedding)
    cluster_out = jnp.asarray(cluster_out)
    N, D = embedding.shape

    # Labels once, in the wrapper (trivial VPU work, avoids K=C mask matmul).
    labels = jnp.argmax(cluster_out, axis=-1).astype(jnp.int32)

    if N <= tile:
        tile = N                       # single full-extent tile, no padding
        n_pad = N
    else:
        tile = max(128, (tile // 128) * 128)       # lane-aligned label blocks
        n_pad = ((N + tile - 1) // tile) * tile

    pad = n_pad - N
    emb = embedding.astype(compute_dtype)
    if pad:
        emb = jnp.pad(emb, ((0, pad), (0, 0)))
        # Unique negative sentinels: padded rows never match anything except
        # themselves on the diagonal, which the trace/count correction removes.
        labels = jnp.concatenate(
            [labels, -1 - jnp.arange(pad, dtype=jnp.int32)])

    labels_col = labels.reshape(n_pad, 1)
    labels_row = labels.reshape(1, n_pad)

    nt = n_pad // tile
    # Upper-triangle tile pairs (j >= i), row-major so bi is constant across
    # consecutive steps (Pallas skips the redundant emb_i re-fetch).
    pairs = [(i, j) for i in range(nt) for j in range(i, nt)]
    num_pairs = len(pairs)
    bi = jnp.asarray([p[0] for p in pairs], dtype=jnp.int32)
    bj = jnp.asarray([p[1] for p in pairs], dtype=jnp.int32)

    grid_spec = pltpu.PrefetchScalarGridSpec(
        num_scalar_prefetch=2,
        grid=(num_pairs,),
        in_specs=[
            pl.BlockSpec((tile, D), lambda t, bi, bj: (bi[t], 0)),   # emb rows i
            pl.BlockSpec((tile, D), lambda t, bi, bj: (bj[t], 0)),   # emb rows j
            pl.BlockSpec((tile, 1), lambda t, bi, bj: (bi[t], 0)),   # labels_i
            pl.BlockSpec((1, tile), lambda t, bi, bj: (0, bj[t])),   # labels_j
        ],
        out_specs=[
            pl.BlockSpec((1, 1, 1), lambda t, bi, bj: (t, 0, 0)),
            pl.BlockSpec((1, 1, 1), lambda t, bi, bj: (t, 0, 0)),
        ],
    )

    itemsize = jnp.dtype(compute_dtype).itemsize
    flops = 2 * D * tile * tile * num_pairs
    bytes_accessed = ((nt + num_pairs) * tile * D * itemsize   # i reused per row
                      + 2 * n_pad * 4 + num_pairs * 8)
    cost = pl.CostEstimate(flops=flops, transcendentals=0,
                           bytes_accessed=bytes_accessed)

    # Explicit VMEM budget sized from the chosen tiles (double-buffered inputs
    # + f32 tile temporaries) with headroom; clamped to be safe on all gens.
    est = (4 * tile * D * itemsize            # emb_i/emb_j, 2 buffers each
           + 8 * tile * 4                     # label strips, 2 buffers each
           + 4 * tile * tile * 4              # gram/same f32 temporaries
           + (2 << 20))
    vmem_limit = int(min(64 * 1024 * 1024, max(16 * 1024 * 1024, 2 * est)))

    partial_sum, partial_cnt = pl.pallas_call(
        _align_loss_kernel,
        out_shape=(jax.ShapeDtypeStruct((num_pairs, 1, 1), jnp.float32),
                   jax.ShapeDtypeStruct((num_pairs, 1, 1), jnp.float32)),
        grid_spec=grid_spec,
        compiler_params=pltpu.CompilerParams(
            dimension_semantics=("parallel",),
            vmem_limit_bytes=vmem_limit),
        cost_estimate=cost,
    )(bi, bj, emb, emb, labels_col, labels_row)

    total = jnp.sum(partial_sum)
    count = jnp.sum(partial_cnt)
    # 0/0 -> NaN matches torch's mean over an empty selection.
    return total / count


def _align_loss_ref(embedding, cluster_out):
    labels = jnp.argmax(cluster_out, axis=-1)
    same = labels[:, None] == labels[None, :]
    off = ~jnp.eye(embedding.shape[0], dtype=bool)
    gram = (embedding @ embedding.T).astype(jnp.float32)
    mask = (same & off).astype(jnp.float32)
    return jnp.sum(gram * mask) / jnp.sum(mask)


if __name__ == "__main__":
    key = jax.random.PRNGKey(0)
    k1, k2, k3, k4 = jax.random.split(key, 4)

    # Small case (single tile): 8 samples, 32-d embedding, 4 clusters.
    N, D, C = 8, 32, 4
    embedding = jax.random.normal(k1, (N, D), dtype=jnp.float32)
    cluster_out = jax.random.normal(k2, (N, C), dtype=jnp.float32)

    loss = align_loss(embedding, cluster_out)
    jax.block_until_ready(loss)
    # Reference with the same bf16 input quantization the kernel uses.
    emb_q = embedding.astype(jnp.bfloat16).astype(jnp.float32)
    ref = _align_loss_ref(emb_q, cluster_out)
    assert jnp.allclose(loss, ref, atol=2e-3, rtol=1e-2), (loss, ref)

    # Larger case exercising tiling, padding and the symmetric (j >= i) grid.
    N2, D2, C2 = 320, 64, 5
    embedding2 = jax.random.normal(k3, (N2, D2), dtype=jnp.float32)
    cluster_out2 = jax.random.normal(k4, (N2, C2), dtype=jnp.float32)

    loss2 = align_loss(embedding2, cluster_out2, tile=128)
    jax.block_until_ready(loss2)
    emb2_q = embedding2.astype(jnp.bfloat16).astype(jnp.float32)
    ref2 = _align_loss_ref(emb2_q, cluster_out2)
    assert jnp.allclose(loss2, ref2, atol=5e-3, rtol=2e-2), (loss2, ref2)

    print("KERNEL_OK")
</pallas_src>

<mosaic_0001>
module attributes {stable_mosaic.version = 11 : i64} {
  func.func @_align_loss_kernel(%arg0: i32, %arg1: memref<1xi32, #tpu.memory_space<smem>>, %arg2: memref<1xi32, #tpu.memory_space<smem>>, %arg3: memref<8x32xbf16, #tpu.memory_space<vmem>>, %arg4: memref<8x32xbf16, #tpu.memory_space<vmem>>, %arg5: memref<8x1xi32, #tpu.memory_space<vmem>>, %arg6: memref<1x8xi32, #tpu.memory_space<vmem>>, %arg7: memref<1x1x1xf32, #tpu.memory_space<vmem>>, %arg8: memref<1x1x1xf32, #tpu.memory_space<vmem>>) attributes {dimension_semantics = [#tpu.dimension_semantics<parallel>], iteration_bounds = array<i64: 1>, scalar_prefetch = 2 : i64, scratch_operands = 0 : i64, tpu.core_type = #tpu.core_type<tc>, window_params = [{transform_indices = @transform_0, window_bounds = array<i64: 8, 32>}, {transform_indices = @transform_1, window_bounds = array<i64: 8, 32>}, {transform_indices = @transform_2, window_bounds = array<i64: 8, 1>}, {transform_indices = @transform_3, window_bounds = array<i64: 1, 8>}, {transform_indices = @transform_4, window_bounds = array<i64: 1, 1, 1>}, {transform_indices = @transform_5, window_bounds = array<i64: 1, 1, 1>}]} {
    %0 = arith.index_cast %arg0 : i32 to index
    %1 = memref.load %arg1[%0] : memref<1xi32, #tpu.memory_space<smem>>
    %2 = arith.index_cast %arg0 : i32 to index
    %3 = memref.load %arg2[%2] : memref<1xi32, #tpu.memory_space<smem>>
    %4 = arith.cmpi eq, %1, %3 : i32
    %c0 = arith.constant 0 : index
    %c0_0 = arith.constant 0 : index
    %5 = vector.load %arg3[%c0, %c0_0] : memref<8x32xbf16, #tpu.memory_space<vmem>>, vector<8x32xbf16>
    %c0_1 = arith.constant 0 : index
    %c0_2 = arith.constant 0 : index
    %6 = vector.load %arg4[%c0_1, %c0_2] : memref<8x32xbf16, #tpu.memory_space<vmem>>, vector<8x32xbf16>
    %cst = arith.constant dense<0.000000e+00> : vector<8x8xf32>
    %7 = tpu.matmul %5, %6, %cst {dimension_numbers = #tpu.dot_dimension_numbers<[1], [1], [0], [0], [0, 0, 1, 0], [], []>} : vector<8x32xbf16>, vector<8x32xbf16>, vector<8x8xf32> -> vector<8x8xf32>
    %c0_3 = arith.constant 0 : index
    %c0_4 = arith.constant 0 : index
    %8 = vector.load %arg5[%c0_3, %c0_4] : memref<8x1xi32, #tpu.memory_space<vmem>>, vector<8x1xi32>
    %c0_5 = arith.constant 0 : index
    %c0_6 = arith.constant 0 : index
    %9 = vector.load %arg6[%c0_5, %c0_6] : memref<1x8xi32, #tpu.memory_space<vmem>>, vector<1x8xi32>
    %10 = vector.broadcast %8 : vector<8x1xi32> to vector<8x8xi32>
    %11 = vector.broadcast %9 : vector<1x8xi32> to vector<8x8xi32>
    %12 = arith.cmpi eq, %10, %11 : vector<8x8xi32>
    %13 = arith.extui %12 : vector<8x8xi1> to vector<8x8xi32>
    %14 = arith.sitofp %13 : vector<8x8xi32> to vector<8x8xf32>
    %15 = arith.mulf %7, %14 : vector<8x8xf32>
    %16 = vector.shape_cast %15 : vector<8x8xf32> to vector<1x8x8xf32>
    %cst_7 = arith.constant dense<0.000000e+00> : vector<1xf32>
    %17 = vector.multi_reduction <add>, %16, %cst_7 [1, 2] : vector<1x8x8xf32> to vector<1xf32>
    %18 = vector.shape_cast %17 : vector<1xf32> to vector<1x1x1xf32>
    %19 = vector.extract %18[0, 0, 0] : f32 from vector<1x1x1xf32>
    %20 = vector.shape_cast %14 : vector<8x8xf32> to vector<1x8x8xf32>
    %cst_8 = arith.constant dense<0.000000e+00> : vector<1xf32>
    %21 = vector.multi_reduction <add>, %20, %cst_8 [1, 2] : vector<1x8x8xf32> to vector<1xf32>
    %22 = vector.shape_cast %21 : vector<1xf32> to vector<1x1x1xf32>
    %23 = vector.extract %22[0, 0, 0] : f32 from vector<1x1x1xf32>
    %cst_9 = arith.constant 2.000000e+00 : f32
    %24 = arith.mulf %cst_9, %19 : f32
    %25 = vector.broadcast %24 : f32 to vector<1x1x1xf32>
    %c0_10 = arith.constant 0 : index
    %c0_11 = arith.constant 0 : index
    %c0_12 = arith.constant 0 : index
    %26 = vector.load %arg7[%c0_10, %c0_11, %c0_12] : memref<1x1x1xf32, #tpu.memory_space<vmem>>, vector<1x1x1xf32>
    tpu.vector_store %arg7[%c0_10, %c0_11, %c0_12], %25 {strides = array<i32>} : memref<1x1x1xf32, #tpu.memory_space<vmem>>, vector<1x1x1xf32>,
    %cst_13 = arith.constant 2.000000e+00 : f32
    %27 = arith.mulf %cst_13, %23 : f32
    %28 = vector.broadcast %27 : f32 to vector<1x1x1xf32>
    %c0_14 = arith.constant 0 : index
    %c0_15 = arith.constant 0 : index
    %c0_16 = arith.constant 0 : index
    %29 = vector.load %arg8[%c0_14, %c0_15, %c0_16] : memref<1x1x1xf32, #tpu.memory_space<vmem>>, vector<1x1x1xf32>
    tpu.vector_store %arg8[%c0_14, %c0_15, %c0_16], %28 {strides = array<i32>} : memref<1x1x1xf32, #tpu.memory_space<vmem>>, vector<1x1x1xf32>,
    %30 = arith.extui %4 : i1 to i32
    %c0_i32 = arith.constant 0 : i32
    %31 = arith.cmpi ne, %30, %c0_i32 : i32
    scf.if %31 {
      %32 = arith.extf %5 : vector<8x32xbf16> to vector<8x32xf32>
      %33 = arith.mulf %32, %32 : vector<8x32xf32>
      %34 = vector.shape_cast %33 : vector<8x32xf32> to vector<1x8x32xf32>
      %cst_17 = arith.constant dense<0.000000e+00> : vector<1xf32>
      %35 = vector.multi_reduction <add>, %34, %cst_17 [1, 2] : vector<1x8x32xf32> to vector<1xf32>
      %36 = vector.shape_cast %35 : vector<1xf32> to vector<1x1x1xf32>
      %37 = vector.extract %36[0, 0, 0] : f32 from vector<1x1x1xf32>
      %38 = arith.subf %19, %37 : f32
      %39 = vector.broadcast %38 : f32 to vector<1x1x1xf32>
      %c0_18 = arith.constant 0 : index
      %c0_19 = arith.constant 0 : index
      %c0_20 = arith.constant 0 : index
      %40 = vector.load %arg7[%c0_18, %c0_19, %c0_20] : memref<1x1x1xf32, #tpu.memory_space<vmem>>, vector<1x1x1xf32>
      tpu.vector_store %arg7[%c0_18, %c0_19, %c0_20], %39 {strides = array<i32>} : memref<1x1x1xf32, #tpu.memory_space<vmem>>, vector<1x1x1xf32>,
      %cst_21 = arith.constant 8.000000e+00 : f32
      %41 = arith.subf %23, %cst_21 : f32
      %42 = vector.broadcast %41 : f32 to vector<1x1x1xf32>
      %c0_22 = arith.constant 0 : index
      %c0_23 = arith.constant 0 : index
      %c0_24 = arith.constant 0 : index
      %43 = vector.load %arg8[%c0_22, %c0_23, %c0_24] : memref<1x1x1xf32, #tpu.memory_space<vmem>>, vector<1x1x1xf32>
      tpu.vector_store %arg8[%c0_22, %c0_23, %c0_24], %42 {strides = array<i32>} : memref<1x1x1xf32, #tpu.memory_space<vmem>>, vector<1x1x1xf32>,
    } else {
    }
    return
  }
  func.func @transform_0(%arg0: i32, %arg1: memref<1xi32, #tpu.memory_space<smem>>, %arg2: memref<1xi32, #tpu.memory_space<smem>>) -> (i32, i32) {
    %0 = arith.index_cast %arg0 : i32 to index
    %1 = memref.load %arg1[%0] : memref<1xi32, #tpu.memory_space<smem>>
    %c0_i32 = arith.constant 0 : i32
    %c0_i32_0 = arith.constant 0 : i32
    return %1, %c0_i32 : i32, i32
  }
  func.func @transform_1(%arg0: i32, %arg1: memref<1xi32, #tpu.memory_space<smem>>, %arg2: memref<1xi32, #tpu.memory_space<smem>>) -> (i32, i32) {
    %0 = arith.index_cast %arg0 : i32 to index
    %1 = memref.load %arg2[%0] : memref<1xi32, #tpu.memory_space<smem>>
    %c0_i32 = arith.constant 0 : i32
    %c0_i32_0 = arith.constant 0 : i32
    return %1, %c0_i32 : i32, i32
  }
  func.func @transform_2(%arg0: i32, %arg1: memref<1xi32, #tpu.memory_space<smem>>, %arg2: memref<1xi32, #tpu.memory_space<smem>>) -> (i32, i32) {
    %0 = arith.index_cast %arg0 : i32 to index
    %1 = memref.load %arg1[%0] : memref<1xi32, #tpu.memory_space<smem>>
    %c0_i32 = arith.constant 0 : i32
    %c0_i32_0 = arith.constant 0 : i32
    return %1, %c0_i32 : i32, i32
  }
  func.func @transform_3(%arg0: i32, %arg1: memref<1xi32, #tpu.memory_space<smem>>, %arg2: memref<1xi32, #tpu.memory_space<smem>>) -> (i32, i32) {
    %0 = arith.index_cast %arg0 : i32 to index
    %1 = memref.load %arg2[%0] : memref<1xi32, #tpu.memory_space<smem>>
    %c0_i32 = arith.constant 0 : i32
    %c0_i32_0 = arith.constant 0 : i32
    return %c0_i32, %1 : i32, i32
  }
  func.func @transform_4(%arg0: i32, %arg1: memref<1xi32, #tpu.memory_space<smem>>, %arg2: memref<1xi32, #tpu.memory_space<smem>>) -> (i32, i32, i32) {
    %c0_i32 = arith.constant 0 : i32
    %c0_i32_0 = arith.constant 0 : i32
    %c0_i32_1 = arith.constant 0 : i32
    return %arg0, %c0_i32, %c0_i32_0 : i32, i32, i32
  }
  func.func @transform_5(%arg0: i32, %arg1: memref<1xi32, #tpu.memory_space<smem>>, %arg2: memref<1xi32, #tpu.memory_space<smem>>) -> (i32, i32, i32) {
    %c0_i32 = arith.constant 0 : i32
    %c0_i32_0 = arith.constant 0 : i32
    %c0_i32_1 = arith.constant 0 : i32
    return %arg0, %c0_i32, %c0_i32_0 : i32, i32, i32
  }
}

</mosaic_0001>

<bundles_post_ra>
// kernel: tpu_custom_call.1
= control target key start
LH: loop header
LB: loop body
LE: loop exit
PB: predicated region body
PF: predicated region fallthrough
CT: control target
= control target key end

     0   :  { %15 = vsyncpa [#allocation6], 0  ;;  %s436_s0 = inlined_call_operand.<no memory space> [shape: s32[1], index: 0, kind: input, shape index: {}]   ;;  %s437_s1 = inlined_call_operand.<no memory space> [shape: s32[1], index: 1, kind: input, shape index: {}]   ;;  %s438_s2 = inlined_call_operand.vmem [shape: bf16[8,32], index: 2, kind: input, shape index: {}]   ;;  %s439_s3 = inlined_call_operand.vmem [shape: bf16[8,32], index: 3, kind: input, shape index: {}]   ;;  %s440_s4 = inlined_call_operand.vmem [shape: s32[8,1], index: 4, kind: input, shape index: {}]   ;;  %s441_s5 = inlined_call_operand.vmem [shape: s32[1,8], index: 5, kind: input, shape index: {}]   ;;  %s442_s6 = inlined_call_operand.hbm [shape: f32[1,1,1], index: 6, kind: output, shape index: {0}]   ;;  %s443_s7 = inlined_call_operand.hbm [shape: f32[1,1,1], index: 7, kind: output, shape index: {1}]  }
   0x1   :  { %16 = vsyncpa [#allocation8], 0  ;;  %p74_p0 = scmp.lt.s32.totalorder %s437_s1, 0  ;;  %v330_v0 = vmov 0.0   ;;  %vm331_vm0 = vmmov 0   ;;  %p68_p1 = scmp.lt.s32.totalorder %s436_s0, 0 }
   0x2   :  { %264 = vmatprep.subr.bf16.mxu0 %v330_v0  ;;  %266 = vmatprep.mubr.msk.bf16.mxu0 %vm331_vm0, %v330_v0  ;;  %v332_v1 = vmov 0   ;;  %vm96_vm1 = vcmask 261120   ;;  %vm156_vm2 = vcmask 64512   ;;  %vm179_vm4 = vcmask 0   ;;  %p260_p2 = scmp.ne.s32.totalorder %s436_s0, %s437_s1 }
   0x3   :  { %s75_s30 = scalar_select %p74_p0, %s437_s1, 0  ;;  %281 = vset.pattern.permute.xlu0 %v332_v1 }
   0x4   :  { %s69_s10 = scalar_select %p68_p1, %s436_s0, 0 }
   0x5   :  { %s255_s11 = sshll.u32 %s75_s30, 2  ;;  %s88_s24 = scalar_lea.vmem %s441_s5, %s75_s30 }
   0x6   :  { %s77_s14 = scalar_lea.vmem %s439_s3, %s255_s11  ;;  %s254_s15 = sshll.u32 %s69_s10, 2  ;;  %v258_v6 = vld [vmem:[%s88_s24] ss:$0 sm:$0xff] }
   0x7   :  { %v95_v2 = vld [vmem:[%s77_s14] sm:$0xf]  ;;  %s256_s16 = sshll.u32 %s69_s10, 3  ;;  %s71_s22 = scalar_lea.vmem %s438_s2, %s254_s15 }
   0x8   :  { %v101_v3 = vsel %vm96_vm1, %v95_v2, 0  ;;  %s83_s19 = scalar_lea.vmem %s440_s4, %s256_s16  ;;  %v94_v5 = vld [vmem:[%s71_s22] sm:$0xf] }
   0x9   :  { %265 = vmatpush3.bf16.xpose.msra.mxu0 %v101_v3  ;;  %v143_v4 = vld [vmem:[%s83_s19] sm:$0xff]  ;;  %v187_v32 = vunpack.c.l.bf16 (!%p260_p2), %v94_v5 }
   0xa   :  { %146 = vperm.xlu0 %281, %v143_v4  }
   0xb   :  { %v188_v33 = vmul.f32 (!%p260_p2), %v187_v32, %v187_v32 }
   0xd   :  { %v189_v34 = vsel (!%p260_p2), %vm96_vm1, %v188_v33, 0.0 }
  0x10   :  { %267 = vmatmul.mubr.msk.bf16.vlgmr.msra.gmra.mrb[0].mxu0 %vm96_vm1, %v94_v5 }
  0x89   :  { %v147_v7 = vpop.permute.xlu0 %146 }
  0x8a   :  { %vm152_vm3 = vcmp.eq.s32.totalorder %v147_v7, %v258_v6 }
  0x8b   :  { %v259_v8 = vsel %vm152_vm3, 1.0, %v330_v0 }
  0x8c   :  { %v167_v9 = vsel %vm156_vm2, %v259_v8, 0.0 }
  0x8d   :  { %168 = vadd.xlane.f32.xlu1 %v167_v9 }
  0xe3   :  { %v137_v10 = vpop.f32.mrb[0].mxu0 }
  0xe4   :  { %v155_v11 = vmul.f32 %v259_v8, %v137_v10  ;;  %v268_v12 = vpop.f32.mrb[1].mxu0 }
  0xe5   :  { %v140_v13 = vpop.f32.mrb[2].mxu0 }
  0xe6   :  { %v269_v14 = vpop.f32.mrb[3].mxu0  ;;  %v157_v15 = vsel %vm156_vm2, %v155_v11, 0.0 }
  0xe7   :  { %158 = vadd.xlane.f32.xlu0 %v157_v15 }
  0xeb   :  { %190 = vadd.xlane.f32.xlu0 (!%p260_p2), %v189_v34 }
 0x11a   :  { %v169_v16 = vpop.xlane.xlu1 %168 }
 0x11b   :  { %v170_v17 = vrot.slane %v169_v16, 4 }
 0x11d   :  { %v171_v18 = vadd.f32 %v170_v17, %v169_v16 }
 0x11f   :  { %v172_v19 = vrot.slane %v171_v18, 2 }
 0x121   :  { %v173_v23 = vadd.f32 %v172_v19, %v171_v18 }
 0x123   :  { %v174_v26 = vrot.slane %v173_v23, 1 }
 0x125   :  { %v175_v29 = vadd.f32 %v174_v26, %v173_v23 }
 0x174   :  { %v159_v20 = vpop.xlane.xlu0 %158 }
 0x175   :  { %v160_v21 = vrot.slane %v159_v20, 4 }
 0x177   :  { %v161_v22 = vadd.f32 %v160_v21, %v159_v20 }
 0x178   :  { %v191_v36 = vpop.xlane.xlu0 (!%p260_p2), %190 }
 0x179   :  { %v162_v24 = vrot.slane %v161_v22, 2  ;;  %v192_v37 = vrot.slane (!%p260_p2), %v191_v36, 4 }
 0x17b   :  { %v163_v25 = vadd.f32 %v162_v24, %v161_v22  ;;  %v193_v38 = vadd.f32 (!%p260_p2), %v192_v37, %v191_v36 }
 0x17d   :  { %v164_v27 = vrot.slane %v163_v25, 1  ;;  %v194_v39 = vrot.slane (!%p260_p2), %v193_v38, 2 }
 0x17f   :  { %v165_v28 = vadd.f32 %v164_v27, %v163_v25  ;;  %v195_v40 = vadd.f32 (!%p260_p2), %v194_v39, %v193_v38 }
 0x181   :  { %270 = vpush %v165_v28  ;;  %v196_v41 = vrot.slane (!%p260_p2), %v195_v40, 1 }
 0x182   :  { %272 = vpush %v175_v29 }
 0x183   :  { %v197_v42 = vadd.f32 (!%p260_p2), %v196_v41, %v195_v40 }
 0x185   :  { %274 = vpush (!%p260_p2), %v197_v42 }
 0x1b1   :  { %186 = sbr.rel (%p260_p2) target bundleno = 443 (0x1bb), region = 21 }
 0x1b2   :  { %s271_s2 = spop %270 }
 0x1b3   :  { %s177_s4 = smul.f32 2.0, %s271_s2  ;;  %s273_s5 = spop %272 }
 0x1b4   :  { %s181_s25 = smul.f32 2.0, %s273_s5  ;;  %s261_s30 = sadd.f32 (!%p260_p2), -8.0, %s273_s5 }
 0x1b5   :  { %v178_v30 = vstv %s177_s4 }
 0x1b6   :  { %180 = vst.msk [vmem:[#allocation5] sm:$0x1] %vm179_vm4, %v178_v30  ;;  %v182_v31 = vstv %s181_s25  ;;  %v203_v35 = vstv (!%p260_p2), %s261_s30  ;;  %s275_s8 = spop (!%p260_p2), %274 }
 0x1b7   :  { %183 = vst.msk [vmem:[#allocation7] sm:$0x1] %vm179_vm4, %v182_v31  ;;  %s199_s0 = ssub.f32 (!%p260_p2), %s271_s2, %s275_s8 }
 0x1b8   :  { %204 = vst.msk [vmem:[#allocation7] sm:$0x1] %vm179_vm4, %v203_v35 }
 0x1b9   :  { %v200_v43 = vstv %s199_s0 }
 0x1ba   :  { %201 = vst.msk [vmem:[#allocation5] sm:$0x1] %vm179_vm4, %v200_v43 }
 0x1bb PF:  { %s333_s1 = smov [#allocation5]   ;;  %s334_s10 = smov [#allocation7]  }
 0x1bc   :  { %s211_s9 = sshll.u32 %s333_s1, 4  ;;  %s221_s11 = sshll.u32 %s334_s10, 4  ;;  %s212_s9 = int_to_ptr.vmem [resolvable:$true] %s211_s9  ;;  %s222_s11 = int_to_ptr.vmem [resolvable:$true] %s221_s11 }
 0x1bd   :  { %s282_s12 = scalar_lea.vmem %s212_s9, 16  ;;  %s286_s13 = scalar_lea.vmem %s212_s9, 32 }
 0x1be   :  { %p283_p3 = scmp.ne.s32.totalorder %s212_s9, %s282_s12  ;;  %p287_p4 = scmp.lt.s32.totalorder %s212_s9, %s212_s9 }
 0x1bf   :  { %p288_p5 = scmp.lt.s32.totalorder %s286_s13, %s282_s12 }
 0x1c1   :  { %p289_p6 = por %p288_p5, %p287_p4 }
 0x1c3   :  { %p290_p7 = pnand %p289_p6, %p283_p3 }
 0x1c5   :  { %293 = shalt.err (!%p290_p7)
}
 0x1c6   :  { %s294_s16 = scalar_lea.hbm %s442_s6, 16 }
 0x1c7   :  { %p295_p8 = scmp.ne.s32.totalorder %s442_s6, %s294_s16  ;;  %p298_p9 = scmp.lt.u32.totalorder %s294_s16, %s442_s6 }
 0x1c9   :  { %p300_p10 = pnand %p298_p9, %p295_p8 }
 0x1cb   :  { %303 = shalt.err (!%p300_p10)
}
 0x1cc   :  { %214 = dma.vmem_to_hbm [thread:$0]  %s212_s9, 16, %s442_s6, [#allocation6]  }
 0x1cd   :  { %s304_s3 = scalar_lea.vmem %s222_s11, 16  ;;  %s308_s23 = scalar_lea.vmem %s222_s11, 32 }
 0x1ce   :  { %p305_p11 = scmp.ne.s32.totalorder %s222_s11, %s304_s3  ;;  %p309_p12 = scmp.lt.s32.totalorder %s222_s11, %s222_s11 }
 0x1cf   :  { %p310_p13 = scmp.lt.s32.totalorder %s308_s23, %s304_s3 }
 0x1d1   :  { %p311_p0 = por %p310_p13, %p309_p12 }
 0x1d3   :  { %p312_p1 = pnand %p311_p0, %p305_p11 }
 0x1d5   :  { %315 = shalt.err (!%p312_p1)
}
 0x1d6   :  { %s316_s4 = scalar_lea.hbm %s443_s7, 16 }
 0x1d7   :  { %p317_p2 = scmp.ne.s32.totalorder %s443_s7, %s316_s4  ;;  %p320_p3 = scmp.lt.u32.totalorder %s316_s4, %s443_s7 }
 0x1d9   :  { %p322_p4 = pnand %p320_p3, %p317_p2 }
 0x1db   :  { %325 = shalt.err (!%p322_p4)
}
 0x1dc   :  { %224 = dma.vmem_to_hbm [thread:$0]  %s222_s11, 16, %s443_s7, [#allocation8]  }
 0x1dd   :  { %326 = dma.done.wait [#allocation6], 16  }
 0x1de   :  { %327 = vsyncadd [#allocation6], 4294967280 }
 0x1df   :  { %328 = dma.done.wait [#allocation8], 16  }
 0x1e0   :  { %329 = vsyncadd [#allocation8], 4294967280 }
 0x1e1   :  { %231 = vsyncpa [#allocation6], 1 }
 0x1e2   :  { %232 = vsyncpa [#allocation8], 1 }

</bundles_post_ra>
